<compile_context>
chip_gen: v5e
topology: v5e:2x2
jax: 0.10.0
libtpu: 0.0.40
codegen_flags: <defaults>
</compile_context>

<pallas_src>
import math

import jax
import jax.numpy as jnp
from jax.experimental import pallas as pl
from jax.experimental.pallas import tpu as pltpu

_LENGTHSCALE = 1.0
_VARIANCE = 1.0          # kernel.kstar(x) == _VARIANCE for every x (RBF diagonal)
_SIG_EPS = 1e-6          # clamp for the posterior-variance scalar
_NEG_HALF_OVER_L2 = -0.5 / (_LENGTHSCALE ** 2)
_HALF_LOG_2PI = 0.5 * math.log(2.0 * math.pi)
_LOG2 = math.log(2.0)


# ----------------------------------------------------------------------------
# plain-JAX RBF kernel (mirrors the `kernel` argument of the PyTorch module);
# used only for the inducing-point Gram matrix (glue) and the test reference.
# ----------------------------------------------------------------------------
class RBFKernel:
    def __init__(self, lengthscale=_LENGTHSCALE, variance=_VARIANCE):
        self.l2 = lengthscale ** 2
        self.var = variance

    def K(self, Z):
        return self.k(Z, Z)

    def k(self, a, b):
        a2 = jnp.sum(a * a, axis=1, keepdims=True)
        b2 = jnp.sum(b * b, axis=1, keepdims=True).T
        ab = jnp.dot(a, b.T, precision=jax.lax.Precision.HIGHEST)
        sq = jnp.maximum(a2 + b2 - 2.0 * ab, 0.0)
        return self.var * jnp.exp(-0.5 * sq / self.l2)

    def kstar(self, x):
        return jnp.full((x.shape[0],), self.var, dtype=x.dtype)


# ----------------------------------------------------------------------------
# Pallas kernels.  Inputs arrive in natural (batch-major) layout and are
# transposed in-kernel; all intermediate math is B-on-lanes so every store is
# lane-dense and the MXU N dimension is the (>=128) batch tile.
# ----------------------------------------------------------------------------
def _head_train_kernel(x_ref, eps_ref, zpack_ref, w_ref, hs_ref, out_ref):
    n_in = zpack_ref.shape[1] - 1
    n_z = w_ref.shape[1]
    n_out = hs_ref.shape[0]

    # In-kernel transposes of the natural-layout tiles (XLU has slack; avoids a
    # full wrapper-side HBM transpose pass over the largest stream).
    x_t = x_ref[...].T            # (n_in,  TB)
    eps_t = eps_ref[...].T        # (n_out, TB)

    zm2 = zpack_ref[:, :n_in]     # (n_z, n_in)   = -2 * Z
    z2 = zpack_ref[:, n_in:]      # (n_z, 1)      = sum(Z*Z, axis=1)
    W = w_ref[...]                # (n_z+n_out, n_z) = [Kzz_inv.T ; (Kzz_inv@u).T]
    h_scale = hs_ref[...]         # (n_out, 1)    = exp(0.5 * clip(v, -20, 2)).T

    # kxz^T = kernel.k(x, Z)^T : (n_z, TB)
    x2 = jnp.sum(x_t * x_t, axis=0, keepdims=True)                     # (1, TB)
    zxm2 = jnp.dot(zm2, x_t, preferred_element_type=jnp.float32)       # (n_z, TB) MXU
    sqd = jnp.maximum(z2 + x2 + zxm2, 0.0)
    kxz = jnp.exp(_NEG_HALF_OVER_L2 * sqd)
    if _VARIANCE != 1.0:          # trace-time constant fold
        kxz = _VARIANCE * kxz

    # One fused MXU matmul: rows [:n_z] -> (kxz @ Kzz_inv)^T, rows [n_z:] -> mu^T.
    kw = jnp.dot(W, kxz, preferred_element_type=jnp.float32)           # (n_z+n_out, TB)
    kxzZ = kw[:n_z, :]                                                  # (n_z, TB)
    mu = kw[n_z:, :]                                                    # (n_out, TB)

    # Sig = (kstar - sum(kxzZ * kxz)) * exp(clip(v, -20, 2)) ; std = sqrt(Sig)
    sig_s = jnp.maximum(
        _VARIANCE - jnp.sum(kxzZ * kxz, axis=0, keepdims=True), _SIG_EPS)  # (1, TB)
    std = jnp.sqrt(sig_s) * h_scale                                     # (n_out, TB)

    # rsample through tanh
    z = mu + std * eps_t
    y = jnp.tanh(z)

    # TransformedDistribution(Normal, TanhTransform).log_prob(y).sum(-1, keepdim):
    #   sum_j [ -0.5*eps_j^2 - 0.5*(log sig_s + v_clip_j) - 0.5*log(2pi) - log_det_j ]
    # The per-output constants (0.5*sum(v_clip) + n_out*0.5*log(2pi)) are added by
    # the wrapper (fuses with the output slice/transpose; saves an input stream).
    log_det = 2.0 * (_LOG2 - z - jnp.logaddexp(0.0, -2.0 * z))
    logp = (-0.5 * jnp.sum(eps_t * eps_t, axis=0, keepdims=True)
            - (0.5 * n_out) * jnp.log(sig_s)
            - jnp.sum(log_det, axis=0, keepdims=True))                  # (1, TB)

    # Packed lane-dense output: rows [:n_out] = y, row [n_out] = logp.
    out_ref[:n_out, :] = y.astype(out_ref.dtype)
    out_ref[n_out:, :] = logp.astype(out_ref.dtype)


def _head_eval_kernel(x_ref, zpack_ref, at_ref, y_ref):
    n_in = zpack_ref.shape[1] - 1

    x_t = x_ref[...].T            # (n_in, TB)
    zm2 = zpack_ref[:, :n_in]     # (n_z, n_in)  = -2 * Z
    z2 = zpack_ref[:, n_in:]      # (n_z, 1)
    A_t = at_ref[...]             # (n_out, n_z) = (Kzz_inv @ u).T

    x2 = jnp.sum(x_t * x_t, axis=0, keepdims=True)                     # (1, TB)
    zxm2 = jnp.dot(zm2, x_t, preferred_element_type=jnp.float32)       # (n_z, TB)
    sqd = jnp.maximum(z2 + x2 + zxm2, 0.0)
    kxz = jnp.exp(_NEG_HALF_OVER_L2 * sqd)
    if _VARIANCE != 1.0:
        kxz = _VARIANCE * kxz

    mu = jnp.dot(A_t, kxz, preferred_element_type=jnp.float32)         # (n_out, TB)
    y_ref[...] = jnp.tanh(mu).astype(y_ref.dtype)


# ----------------------------------------------------------------------------
# Parameter-only precompute (cacheable across calls when Z/u/v are fixed).
# ----------------------------------------------------------------------------
def _kzz_inverse(Z):
    """Kzz^-1 via jittered Cholesky solve (better conditioned than a raw inverse)."""
    # TODO(synk): dense Cholesky / solve has no Pallas TPU primitive; plain-JAX glue.
    kern = RBFKernel()
    n_z = Z.shape[0]
    Kzz = kern.K(Z.astype(jnp.float32)) + 1e-6 * jnp.eye(n_z, dtype=jnp.float32)
    L = jax.scipy.linalg.cholesky(Kzz, lower=True)
    return jax.scipy.linalg.cho_solve((L, True), jnp.eye(n_z, dtype=jnp.float32))


def precompute_head_params(Z, u, v):
    """One-time parameter precompute.  Cache the result if Z/u/v are fixed."""
    Zf = Z.astype(jnp.float32)
    uf = u.astype(jnp.float32)
    vf = v.astype(jnp.float32)
    n_out = uf.shape[1]

    Kzz_inv = _kzz_inverse(Zf)                                   # (n_z, n_z)
    z2 = jnp.sum(Zf * Zf, axis=1, keepdims=True)                 # (n_z, 1)
    zpack = jnp.concatenate([-2.0 * Zf, z2], axis=1)             # (n_z, n_in+1)
    A = Kzz_inv @ uf                                             # (n_z, n_out)
    W = jnp.concatenate([Kzz_inv.T, A.T], axis=0)                # (n_z+n_out, n_z)
    v_clip = jnp.clip(vf, -20.0, 2.0)                            # (1, n_out)
    h_scale = jnp.exp(0.5 * v_clip).T                            # (n_out, 1)
    logp_const = 0.5 * jnp.sum(v_clip) + n_out * _HALF_LOG_2PI   # scalar
    return dict(zpack=zpack, W=W, A_t=A.T, h_scale=h_scale, logp_const=logp_const)


# ----------------------------------------------------------------------------
# Wrapper reproducing SquashedGaussianProcessHead.forward.
# ----------------------------------------------------------------------------
def _batch_tiling(B, tile_b):
    b_lanes = pl.cdiv(B, 128) * 128            # batch rounded up to a lane multiple
    tb = min(int(tile_b), b_lanes)
    tb = pl.cdiv(tb, 128) * 128                # lane-aligned tile
    # v7x has 2 TensorCores: keep >= 2 "parallel" grid steps when the batch allows
    # (on v5e/v6e the extra step costs ~0.35us -- negligible).
    if (b_lanes // tb) < 2 and b_lanes >= 256:
        tb = pl.cdiv(b_lanes // 2, 128) * 128
    B_pad = pl.cdiv(B, tb) * tb
    return tb, B_pad, B_pad // tb


def squashed_gaussian_head(x, Z, u, v, eps=None, *, is_training=True,
                           tile_b=4096, params=None):
    """JAX wrapper reproducing SquashedGaussianProcessHead.forward.

    x:(B, n_in), Z:(n_z, n_in), u:(n_z, n_out), v:(1, n_out), eps:(B, n_out) noise
    (required when is_training=True).  `params` may be the cached result of
    precompute_head_params(Z, u, v).  Returns (y, y_logprob) like the module.
    """
    B, n_in = x.shape
    n_z, n_out = u.shape
    if params is None:
        params = precompute_head_params(Z, u, v)

    tb, B_pad, n_blocks = _batch_tiling(B, tile_b)
    grid = (n_blocks,)

    # Natural layout + single pad (no wrapper-side transpose pass over x/eps).
    x_p = jnp.pad(x.astype(jnp.float32), ((0, B_pad - B), (0, 0)))

    batch_map = lambda i: (i, 0)     # x / eps tiles walk the batch (sublane) axis
    out_map = lambda i: (0, i)       # outputs are B-on-lanes (lane-dense stores)
    full_map = lambda i: (0, 0)      # resident parameters

    if is_training:
        if eps is None:
            raise ValueError("training mode requires reparameterization noise `eps`")
        eps_p = jnp.pad(eps.astype(jnp.float32), ((0, B_pad - B), (0, 0)))

        cost = pl.CostEstimate(
            flops=2 * B_pad * (n_z * n_in + (n_z + n_out) * n_z),
            transcendentals=B_pad * (n_z + 3 * n_out + 2),
            bytes_accessed=4 * (B_pad * (n_in + 2 * n_out + 1)
                                + n_z * (n_in + 1) + (n_z + n_out) * n_z + n_out),
        )

        out = pl.pallas_call(
            _head_train_kernel,
            out_shape=jax.ShapeDtypeStruct((n_out + 1, B_pad), jnp.float32),
            grid_spec=pltpu.PrefetchScalarGridSpec(
                num_scalar_prefetch=0,
                grid=grid,
                in_specs=[
                    pl.BlockSpec((tb, n_in), batch_map),          # x  (natural)
                    pl.BlockSpec((tb, n_out), batch_map),         # eps (natural)
                    pl.BlockSpec((n_z, n_in + 1), full_map),      # [-2Z | z2]
                    pl.BlockSpec((n_z + n_out, n_z), full_map),   # [Kzz_inv.T ; A.T]
                    pl.BlockSpec((n_out, 1), full_map),           # exp(0.5*v_clip)
                ],
                out_specs=pl.BlockSpec((n_out + 1, tb), out_map), # [y ; logp]
            ),
            compiler_params=pltpu.CompilerParams(
                dimension_semantics=("parallel",)),
            cost_estimate=cost,
        )(x_p, eps_p, params["zpack"], params["W"], params["h_scale"])

        y = out[:n_out, :B].T                                     # (B, n_out)
        # Per-output log-prob constants folded here (fuses with slice/transpose).
        y_logprob = out[n_out:, :B].T - params["logp_const"]      # (B, 1)
        return y, y_logprob

    # ---- eval mode: deterministic tanh(mu) only --------------------------------
    cost = pl.CostEstimate(
        flops=2 * B_pad * (n_z * n_in + n_out * n_z),
        transcendentals=B_pad * (n_z + n_out),
        bytes_accessed=4 * (B_pad * (n_in + n_out) + n_z * (n_in + 1) + n_out * n_z),
    )

    y_t = pl.pallas_call(
        _head_eval_kernel,
        out_shape=jax.ShapeDtypeStruct((n_out, B_pad), jnp.float32),
        grid_spec=pltpu.PrefetchScalarGridSpec(
            num_scalar_prefetch=0,
            grid=grid,
            in_specs=[
                pl.BlockSpec((tb, n_in), batch_map),              # x (natural)
                pl.BlockSpec((n_z, n_in + 1), full_map),          # [-2Z | z2]
                pl.BlockSpec((n_out, n_z), full_map),             # (Kzz_inv @ u).T
            ],
            out_specs=pl.BlockSpec((n_out, tb), out_map),
        ),
        compiler_params=pltpu.CompilerParams(
            dimension_semantics=("parallel",)),
        cost_estimate=cost,
    )(x_p, params["zpack"], params["A_t"])

    return y_t[:, :B].T, None


# ----------------------------------------------------------------------------
# Pure-JAX reference (mirrors the PyTorch forward) for sanity checking.
# ----------------------------------------------------------------------------
def _reference_forward(x, Z, u, v, eps, is_training):
    kern = RBFKernel()
    Kzz_inv = _kzz_inverse(Z)
    kxz = kern.k(x.astype(jnp.float32), Z.astype(jnp.float32))
    kxzZ = jnp.dot(kxz, Kzz_inv, precision=jax.lax.Precision.HIGHEST)
    mu = jnp.dot(kxzZ, u, precision=jax.lax.Precision.HIGHEST)
    sig = (kern.kstar(x) - jnp.sum(kxzZ * kxz, axis=1)).reshape(-1, 1)
    sig = jnp.maximum(sig, _SIG_EPS)
    if not is_training:
        return jnp.tanh(mu), None
    Sig = sig * jnp.exp(jnp.clip(v, -20.0, 2.0))
    std = jnp.sqrt(Sig)
    z = mu + std * eps
    y = jnp.tanh(z)
    log_normal = -0.5 * eps * eps - 0.5 * jnp.log(Sig) - _HALF_LOG_2PI
    log_det = 2.0 * (_LOG2 - z - jnp.logaddexp(0.0, -2.0 * z))
    logp = jnp.sum(log_normal - log_det, axis=-1, keepdims=True)
    return y, logp


if __name__ == "__main__":
    # Small shapes consistent with the module: flat features in, n_out actions out.
    B, n_in, n_out, n_z = 8, 16, 4, 32

    key = jax.random.PRNGKey(0)
    kx, kz, ku, kv, ke, kx2, ke2 = jax.random.split(key, 7)

    # 0.25 scale keeps x near the inducing set so the RBF values are non-trivial
    # (exercises the GP math rather than just the kernel tails).
    x = 0.25 * jax.random.normal(kx, (B, n_in), jnp.float32)
    Z = 0.25 * jax.random.normal(kz, (n_z, n_in), jnp.float32)
    u = jax.random.normal(ku, (n_z, n_out), jnp.float32)
    v = jax.random.normal(kv, (1, n_out), jnp.float32)
    eps = jax.random.normal(ke, (B, n_out), jnp.float32)

    params = precompute_head_params(Z, u, v)   # cacheable across calls

    # training mode
    y, y_logprob = squashed_gaussian_head(x, Z, u, v, eps,
                                          is_training=True, params=params)
    jax.block_until_ready((y, y_logprob))
    assert y.shape == (B, n_out) and y_logprob.shape == (B, 1)
    assert bool(jnp.all(jnp.isfinite(y))) and bool(jnp.all(jnp.isfinite(y_logprob)))
    assert bool(jnp.all(jnp.abs(y) <= 1.0))
    y_ref, lp_ref = _reference_forward(x, Z, u, v, eps, True)
    assert bool(jnp.allclose(y, y_ref, atol=1e-1, rtol=5e-2))
    assert bool(jnp.allclose(y_logprob, lp_ref, atol=3e-1, rtol=5e-2))

    # eval mode (no noise, no logprob)
    y_eval, lp_eval = squashed_gaussian_head(x, Z, u, v,
                                             is_training=False, params=params)
    jax.block_until_ready(y_eval)
    assert lp_eval is None and y_eval.shape == (B, n_out)
    ye_ref, _ = _reference_forward(x, Z, u, v, None, False)
    assert bool(jnp.all(jnp.isfinite(y_eval)))
    assert bool(jnp.allclose(y_eval, ye_ref, atol=1e-1, rtol=5e-2))

    # multi-tile / padded-batch path (grid >= 2, batch not a multiple of the tile)
    B2 = 300
    x2 = 0.25 * jax.random.normal(kx2, (B2, n_in), jnp.float32)
    eps2 = jax.random.normal(ke2, (B2, n_out), jnp.float32)
    y2, lp2 = squashed_gaussian_head(x2, Z, u, v, eps2,
                                     is_training=True, params=params)
    jax.block_until_ready((y2, lp2))
    y2_ref, lp2_ref = _reference_forward(x2, Z, u, v, eps2, True)
    assert y2.shape == (B2, n_out) and lp2.shape == (B2, 1)
    assert bool(jnp.allclose(y2, y2_ref, atol=1e-1, rtol=5e-2))
    assert bool(jnp.allclose(lp2, lp2_ref, atol=3e-1, rtol=5e-2))

    print("KERNEL_OK")
</pallas_src>

<mosaic_0001>
module attributes {stable_mosaic.version = 11 : i64} {
  func.func @_head_train_kernel(%arg0: i32, %arg1: memref<128x16xf32, #tpu.memory_space<vmem>>, %arg2: memref<128x4xf32, #tpu.memory_space<vmem>>, %arg3: memref<32x17xf32, #tpu.memory_space<vmem>>, %arg4: memref<36x32xf32, #tpu.memory_space<vmem>>, %arg5: memref<4x1xf32, #tpu.memory_space<vmem>>, %arg6: memref<5x128xf32, #tpu.memory_space<vmem>>) attributes {dimension_semantics = [#tpu.dimension_semantics<parallel>], iteration_bounds = array<i64: 1>, scalar_prefetch = 0 : i64, scratch_operands = 0 : i64, tpu.core_type = #tpu.core_type<tc>, window_params = [{transform_indices = @transform_0, window_bounds = array<i64: 128, 16>}, {transform_indices = @transform_1, window_bounds = array<i64: 128, 4>}, {pipeline_mode = #tpu.pipeline_mode<synchronous>, transform_indices = @transform_2, window_bounds = array<i64: 32, 17>}, {pipeline_mode = #tpu.pipeline_mode<synchronous>, transform_indices = @transform_3, window_bounds = array<i64: 36, 32>}, {pipeline_mode = #tpu.pipeline_mode<synchronous>, transform_indices = @transform_4, window_bounds = array<i64: 4, 1>}, {transform_indices = @transform_5, window_bounds = array<i64: 5, 128>}]} {
    %c0 = arith.constant 0 : index
    %c0_0 = arith.constant 0 : index
    %0 = vector.load %arg1[%c0, %c0_0] : memref<128x16xf32, #tpu.memory_space<vmem>>, vector<128x16xf32>
    %1 = tpu.transpose %0, [1, 0] : vector<128x16xf32> -> vector<16x128xf32>
    %c0_1 = arith.constant 0 : index
    %c0_2 = arith.constant 0 : index
    %2 = vector.load %arg2[%c0_1, %c0_2] : memref<128x4xf32, #tpu.memory_space<vmem>>, vector<128x4xf32>
    %3 = tpu.transpose %2, [1, 0] : vector<128x4xf32> -> vector<4x128xf32>
    %c0_3 = arith.constant 0 : index
    %c0_4 = arith.constant 0 : index
    %4 = vector.load %arg3[%c0_3, %c0_4] : memref<32x17xf32, #tpu.memory_space<vmem>>, vector<32x16xf32>
    %c0_5 = arith.constant 0 : index
    %c16 = arith.constant 16 : index
    %5 = vector.load %arg3[%c0_5, %c16] : memref<32x17xf32, #tpu.memory_space<vmem>>, vector<32x1xf32>
    %c0_6 = arith.constant 0 : index
    %c0_7 = arith.constant 0 : index
    %6 = vector.load %arg4[%c0_6, %c0_7] : memref<36x32xf32, #tpu.memory_space<vmem>>, vector<36x32xf32>
    %c0_8 = arith.constant 0 : index
    %c0_9 = arith.constant 0 : index
    %7 = vector.load %arg5[%c0_8, %c0_9] : memref<4x1xf32, #tpu.memory_space<vmem>>, vector<4x1xf32>
    %8 = arith.mulf %1, %1 : vector<16x128xf32>
    %cst = arith.constant dense<0.000000e+00> : vector<128xf32>
    %9 = vector.multi_reduction <add>, %8, %cst [0] : vector<16x128xf32> to vector<128xf32>
    %10 = vector.shape_cast %9 : vector<128xf32> to vector<1x128xf32>
    %cst_10 = arith.constant dense<0.000000e+00> : vector<32x128xf32>
    %11 = tpu.matmul %4, %1, %cst_10 {dimension_numbers = #tpu.dot_dimension_numbers<[1], [0], [0], [1], [0, 0, 1, 1], [], []>} : vector<32x16xf32>, vector<16x128xf32>, vector<32x128xf32> -> vector<32x128xf32>
    %12 = vector.broadcast %5 : vector<32x1xf32> to vector<32x128xf32>
    %13 = vector.broadcast %10 : vector<1x128xf32> to vector<32x128xf32>
    %14 = arith.addf %12, %13 : vector<32x128xf32>
    %15 = arith.addf %14, %11 : vector<32x128xf32>
    %cst_11 = arith.constant 0.000000e+00 : f32
    %16 = vector.broadcast %cst_11 : f32 to vector<32x128xf32>
    %17 = arith.maximumf %15, %16 : vector<32x128xf32>
    %cst_12 = arith.constant -5.000000e-01 : f32
    %18 = vector.broadcast %cst_12 : f32 to vector<32x128xf32>
    %19 = arith.mulf %18, %17 : vector<32x128xf32>
    %20 = math.exp %19 : vector<32x128xf32>
    %cst_13 = arith.constant dense<0.000000e+00> : vector<36x128xf32>
    %21 = tpu.matmul %6, %20, %cst_13 {dimension_numbers = #tpu.dot_dimension_numbers<[1], [0], [0], [1], [0, 0, 1, 1], [], []>} : vector<36x32xf32>, vector<32x128xf32>, vector<36x128xf32> -> vector<36x128xf32>
    %22 = vector.extract_strided_slice %21 {offsets = [0, 0], sizes = [32, 128], strides = [1, 1]} : vector<36x128xf32> to vector<32x128xf32>
    %23 = vector.extract_strided_slice %21 {offsets = [32, 0], sizes = [4, 128], strides = [1, 1]} : vector<36x128xf32> to vector<4x128xf32>
    %24 = arith.mulf %22, %20 : vector<32x128xf32>
    %cst_14 = arith.constant dense<0.000000e+00> : vector<128xf32>
    %25 = vector.multi_reduction <add>, %24, %cst_14 [0] : vector<32x128xf32> to vector<128xf32>
    %26 = vector.shape_cast %25 : vector<128xf32> to vector<1x128xf32>
    %cst_15 = arith.constant 1.000000e+00 : f32
    %27 = vector.broadcast %cst_15 : f32 to vector<1x128xf32>
    %28 = arith.subf %27, %26 : vector<1x128xf32>
    %cst_16 = arith.constant 9.99999997E-7 : f32
    %29 = vector.broadcast %cst_16 : f32 to vector<1x128xf32>
    %30 = arith.maximumf %28, %29 : vector<1x128xf32>
    %31 = math.sqrt %30 : vector<1x128xf32>
    %32 = vector.broadcast %31 : vector<1x128xf32> to vector<4x128xf32>
    %33 = vector.broadcast %7 : vector<4x1xf32> to vector<4x128xf32>
    %34 = arith.mulf %32, %33 : vector<4x128xf32>
    %35 = arith.mulf %34, %3 : vector<4x128xf32>
    %36 = arith.addf %23, %35 : vector<4x128xf32>
    %37 = math.tanh %36 : vector<4x128xf32>
    %cst_17 = arith.constant 0.693147182 : f32
    %38 = vector.broadcast %cst_17 : f32 to vector<4x128xf32>
    %39 = arith.subf %38, %36 : vector<4x128xf32>
    %cst_18 = arith.constant -2.000000e+00 : f32
    %40 = vector.broadcast %cst_18 : f32 to vector<4x128xf32>
    %41 = arith.mulf %40, %36 : vector<4x128xf32>
    %cst_19 = arith.constant 0.000000e+00 : f32
    %42 = vector.broadcast %cst_19 : f32 to vector<4x128xf32>
    %43 = arith.maximumf %42, %41 : vector<4x128xf32>
    %44 = vector.broadcast %cst_19 : f32 to vector<4x128xf32>
    %45 = arith.subf %44, %41 : vector<4x128xf32>
    %46 = arith.cmpf one, %45, %45 : vector<4x128xf32>
    %47 = vector.broadcast %cst_19 : f32 to vector<4x128xf32>
    %48 = arith.addf %47, %41 : vector<4x128xf32>
    %49 = math.absf %45 : vector<4x128xf32>
    %cst_20 = arith.constant 0.000000e+00 : f32
    %50 = vector.broadcast %cst_20 : f32 to vector<4x128xf32>
    %51 = arith.subf %50, %49 : vector<4x128xf32>
    %52 = math.exp %51 : vector<4x128xf32>
    %53 = math.log1p %52 : vector<4x128xf32>
    %54 = arith.addf %43, %53 : vector<4x128xf32>
    %55 = arith.select %46, %48, %54 : vector<4x128xi1>, vector<4x128xf32>
    %56 = arith.subf %39, %55 : vector<4x128xf32>
    %cst_21 = arith.constant 2.000000e+00 : f32
    %57 = vector.broadcast %cst_21 : f32 to vector<4x128xf32>
    %58 = arith.mulf %57, %56 : vector<4x128xf32>
    %59 = arith.mulf %3, %3 : vector<4x128xf32>
    %cst_22 = arith.constant dense<0.000000e+00> : vector<128xf32>
    %60 = vector.multi_reduction <add>, %59, %cst_22 [0] : vector<4x128xf32> to vector<128xf32>
    %61 = vector.shape_cast %60 : vector<128xf32> to vector<1x128xf32>
    %cst_23 = arith.constant -5.000000e-01 : f32
    %62 = vector.broadcast %cst_23 : f32 to vector<1x128xf32>
    %63 = arith.mulf %62, %61 : vector<1x128xf32>
    %64 = math.log %30 : vector<1x128xf32>
    %cst_24 = arith.constant 2.000000e+00 : f32
    %65 = vector.broadcast %cst_24 : f32 to vector<1x128xf32>
    %66 = arith.mulf %65, %64 : vector<1x128xf32>
    %67 = arith.subf %63, %66 : vector<1x128xf32>
    %cst_25 = arith.constant dense<0.000000e+00> : vector<128xf32>
    %68 = vector.multi_reduction <add>, %58, %cst_25 [0] : vector<4x128xf32> to vector<128xf32>
    %69 = vector.shape_cast %68 : vector<128xf32> to vector<1x128xf32>
    %70 = arith.subf %67, %69 : vector<1x128xf32>
    %c0_26 = arith.constant 0 : index
    %c0_27 = arith.constant 0 : index
    %71 = vector.load %arg6[%c0_26, %c0_27] : memref<5x128xf32, #tpu.memory_space<vmem>>, vector<4x128xf32>
    tpu.vector_store %arg6[%c0_26, %c0_27], %37 {strides = array<i32>} : memref<5x128xf32, #tpu.memory_space<vmem>>, vector<4x128xf32>,
    %c4 = arith.constant 4 : index
    %c0_28 = arith.constant 0 : index
    %72 = vector.load %arg6[%c4, %c0_28] : memref<5x128xf32, #tpu.memory_space<vmem>>, vector<1x128xf32>
    tpu.vector_store %arg6[%c4, %c0_28], %70 {strides = array<i32>} : memref<5x128xf32, #tpu.memory_space<vmem>>, vector<1x128xf32>,
    return
  }
  func.func @transform_0(%arg0: i32) -> (i32, i32) {
    %c0_i32 = arith.constant 0 : i32
    %c0_i32_0 = arith.constant 0 : i32
    return %arg0, %c0_i32 : i32, i32
  }
  func.func @transform_1(%arg0: i32) -> (i32, i32) {
    %c0_i32 = arith.constant 0 : i32
    %c0_i32_0 = arith.constant 0 : i32
    return %arg0, %c0_i32 : i32, i32
  }
  func.func @transform_2(%arg0: i32) -> (i32, i32) {
    %c0_i32 = arith.constant 0 : i32
    %c0_i32_0 = arith.constant 0 : i32
    %c0_i32_1 = arith.constant 0 : i32
    return %c0_i32, %c0_i32_0 : i32, i32
  }
  func.func @transform_3(%arg0: i32) -> (i32, i32) {
    %c0_i32 = arith.constant 0 : i32
    %c0_i32_0 = arith.constant 0 : i32
    %c0_i32_1 = arith.constant 0 : i32
    return %c0_i32, %c0_i32_0 : i32, i32
  }
  func.func @transform_4(%arg0: i32) -> (i32, i32) {
    %c0_i32 = arith.constant 0 : i32
    %c0_i32_0 = arith.constant 0 : i32
    %c0_i32_1 = arith.constant 0 : i32
    return %c0_i32, %c0_i32_0 : i32, i32
  }
  func.func @transform_5(%arg0: i32) -> (i32, i32) {
    %c0_i32 = arith.constant 0 : i32
    %c0_i32_0 = arith.constant 0 : i32
    return %c0_i32, %arg0 : i32, i32
  }
}

</mosaic_0001>

<bundles_post_ra>
// kernel: tpu_custom_call.1
= control target key start
LH: loop header
LB: loop body
LE: loop exit
PB: predicated region body
PF: predicated region fallthrough
CT: control target
= control target key end

     0   :  { %s610_s0 = inlined_call_operand.vmem [shape: f32[128,16], index: 0, kind: input, shape index: {}]   ;;  %s611_s1 = inlined_call_operand.vmem [shape: f32[128,4], index: 1, kind: input, shape index: {}]   ;;  %s612_s2 = inlined_call_operand.vmem [shape: f32[32,17], index: 2, kind: input, shape index: {}]   ;;  %s613_s3 = inlined_call_operand.vmem [shape: f32[36,32], index: 3, kind: input, shape index: {}]   ;;  %s614_s4 = inlined_call_operand.vmem [shape: f32[4,1], index: 4, kind: input, shape index: {}]   ;;  %s615_s5 = inlined_call_operand.hbm [shape: f32[5,128], index: 5, kind: output, shape index: {}]  }
   0x1   :  { %v21_v0 = vld [vmem:[%s610_s0] sm:$0xff] }
   0x2   :  { %37 = vxpose.xlu0.b32.start [1/16] (narrow) %v21_v0, 16 }
   0x3   :  { %10 = vsyncpa [#allocation3], 0  ;;  %v22_v1 = vld [vmem:[%s610_s0 + $0x8] sm:$0xff]  ;;  %v23_v2 = vld [vmem:[%s610_s0 + $0x10] sm:$0xff]  ;;  %v435_v6 = vmov 16   ;;  %vm136_vm0 = vcmask 130048  }
   0x4   :  { %v24_v3 = vld [vmem:[%s610_s0 + $0x18] sm:$0xff]  ;;  %v25_v4 = vld [vmem:[%s610_s0 + $0x20] sm:$0xff]  ;;  %387 = vset.pattern.permute.xlu1 %v435_v6  ;;  %388 = vset.pattern.permute.xlu2 %v435_v6  ;;  %v26_v7 = vld [vmem:[%s610_s0 + $0x28] sm:$0xff]  ;;  %vm218_vm1 = vcmask 261120   ;;  %vm326_vm4 = vcmask 1043456   ;;  %s356_s24 = sshll.u32 %s615_s5, 4  ;;  %s357_s24 = int_to_ptr.hbm [resolvable:$true] %s356_s24 }
   0x5   :  { %v120_v5 = vld [vmem:[%s612_s2 + $0x18] sm:$0xff]  ;;  %v119_v8 = vld [vmem:[%s612_s2 + $0x10] sm:$0xff]  ;;  %v118_v11 = vld [vmem:[%s612_s2 + $0x8] sm:$0xff] }
   0x6   :  { %191 = vperm.xlu1 %387, %v120_v5   ;;  %v27_v9 = vld [vmem:[%s610_s0 + $0x30] sm:$0xff]  ;;  %v28_v10 = vld [vmem:[%s610_s0 + $0x38] sm:$0xff]  ;;  %183 = vperm.xlu2 %388, %v118_v11   ;;  %v29_v12 = vld [vmem:[%s610_s0 + $0x40] sm:$0xff] }
   0x7   :  { %v117_v13 = vld [vmem:[%s612_s2] sm:$0xff]  ;;  %v30_v14 = vld [vmem:[%s610_s0 + $0x48] sm:$0xff]  ;;  %v31_v15 = vld [vmem:[%s610_s0 + $0x50] sm:$0xff] }
   0x8   :  { %v32_v16 = vld [vmem:[%s610_s0 + $0x58] sm:$0xff]  ;;  %v33_v17 = vld [vmem:[%s610_s0 + $0x60] sm:$0xff]  ;;  %v34_v18 = vld [vmem:[%s610_s0 + $0x68] sm:$0xff] }
   0x9   :  { %v35_v19 = vld [vmem:[%s610_s0 + $0x70] sm:$0xff]  ;;  %v36_v20 = vld [vmem:[%s610_s0 + $0x78] sm:$0xff]  ;;  %v69_v34 = vld [vmem:[%s611_s1] sm:$0xff] }
   0xa   :  { %38 = vxpose.xlu0.b32.cont [2/16] (narrow) %v22_v1, 16  ;;  %v70_v39 = vld [vmem:[%s611_s1 + $0x8] sm:$0xff]  ;;  %v71_v52 = vld [vmem:[%s611_s1 + $0x10] sm:$0xff]  ;;  %v72_v62 = vld [vmem:[%s611_s1 + $0x18] sm:$0xff] }
   0xb   :  { %v122_v6 = vld [vmem:[%s613_s3 + $0x8] sm:$0xff] }
   0xe   :  { %187 = vperm.xlu1 %387, %v119_v8   ;;  %179 = vperm.xlu2 %388, %v117_v13  }
  0x12   :  { %39 = vxpose.xlu0.b32.cont [3/16] (narrow) %v23_v2, 16  ;;  %v73_v2 = vld [vmem:[%s611_s1 + $0x20] sm:$0xff] }
  0x1a   :  { %40 = vxpose.xlu0.b32.cont [4/16] (narrow) %v24_v3, 16 }
  0x22   :  { %41 = vxpose.xlu0.b32.cont [5/16] (narrow) %v25_v4, 16  ;;  %v121_v4 = vld [vmem:[%s613_s3] sm:$0xff] }
  0x2a   :  { %42 = vxpose.xlu0.b32.cont [6/16] (narrow) %v26_v7, 16  ;;  %v124_v7 = vld [vmem:[%s613_s3 + $0x18] sm:$0xff] }
  0x32   :  { %43 = vxpose.xlu0.b32.cont [7/16] (narrow) %v27_v9, 16  ;;  %v436_v9 = vmov 0  }
  0x33   :  { %389 = vset.pattern.permute.xlu1 %v436_v9 }
  0x34   :  { %85 = vxpose.xlu2.b32.start [1/16] (narrow) %v69_v34, 8 }
  0x3a   :  { %44 = vxpose.xlu0.b32.cont [8/16] (narrow) %v28_v10, 16  ;;  %v74_v10 = vld [vmem:[%s611_s1 + $0x28] sm:$0xff] }
  0x3c   :  { %86 = vxpose.xlu2.b32.cont [2/16] (narrow) %v70_v39, 8 }
  0x42   :  { %45 = vxpose.xlu0.b32.cont [9/16] (narrow) %v29_v12, 16  ;;  %v125_v12 = vld [vmem:[%s613_s3 + $0x20] sm:$0xf] }
  0x44   :  { %87 = vxpose.xlu2.b32.cont [3/16] (narrow) %v71_v52, 8 }
  0x4a   :  { %46 = vxpose.xlu0.b32.cont [10/16] (narrow) %v30_v14, 16  ;;  %v76_v14 = vld [vmem:[%s611_s1 + $0x38] sm:$0xff] }
  0x4c   :  { %88 = vxpose.xlu2.b32.cont [4/16] (narrow) %v72_v62, 8 }
  0x52   :  { %47 = vxpose.xlu0.b32.cont [11/16] (narrow) %v31_v15, 16  ;;  %v77_v15 = vld [vmem:[%s611_s1 + $0x40] sm:$0xff] }
  0x54   :  { %89 = vxpose.xlu2.b32.cont [5/16] (narrow) %v73_v2, 8 }
  0x5a   :  { %48 = vxpose.xlu0.b32.cont [12/16] (narrow) %v32_v16, 16  ;;  %v78_v16 = vld [vmem:[%s611_s1 + $0x48] sm:$0xff] }
  0x5c   :  { %90 = vxpose.xlu2.b32.cont [6/16] (narrow) %v74_v10, 8 }
  0x60   :  { %v184_v31 = vpop.permute.xlu2 %183 }
  0x62   :  { %49 = vxpose.xlu0.b32.cont [13/16] (narrow) %v33_v17, 16  ;;  %v79_v17 = vld [vmem:[%s611_s1 + $0x50] sm:$0xff] }
  0x68   :  { %v180_v40 = vpop.permute.xlu2 %179 }
  0x6a   :  { %50 = vxpose.xlu0.b32.cont [14/16] (narrow) %v34_v18, 16  ;;  %v80_v18 = vld [vmem:[%s611_s1 + $0x58] sm:$0xff] }
  0x72   :  { %51 = vxpose.xlu0.b32.cont [15/16] (narrow) %v35_v19, 16  ;;  %v81_v19 = vld [vmem:[%s611_s1 + $0x60] sm:$0xff] }
  0x78   :  { %v192_v29 = vpop.permute.xlu1 %191 }
  0x7a   :  { %52 = vxpose.xlu0.b32.end [16/16] (narrow) %v36_v20, 16  ;;  %v82_v20 = vld [vmem:[%s611_s1 + $0x68] sm:$0xff] }
  0x80   :  { %v188_v36 = vpop.permute.xlu1 %187 }
  0xa6   :  { %v53_v21 = vpop.trf.xlu0 }
  0xa7   :  { %v127_v23 = vmul.f32 %v53_v21, %v53_v21 }
  0xae   :  { %v54_v22 = vpop.trf.xlu0 }
  0xaf   :  { %v128_v24 = vmul.f32 %v54_v22, %v54_v22  ;;  %163 = vmatpush.msra.mxu0 %v54_v22  ;;  %374 = vmatpush.msra.mxu3 %v54_v22  ;;  %v84_v22 = vld [vmem:[%s611_s1 + $0x78] sm:$0xff] }
  0xb1   :  { %v129_v25 = vadd.f32 %v128_v24, %v127_v23  ;;  %164 = vmatpush.msra.mxu0 %v53_v21  ;;  %375 = vmatpush.msra.mxu3 %v53_v21  ;;  %v83_v21 = vld [vmem:[%s611_s1 + $0x70] sm:$0xff] }
  0xb2   :  { %365 = vmatmul.msk.f32.vlgmr.msra.gmra.mxu0 %vm136_vm0, %v117_v13  ;;  %366 = vmatmul.msk.f32.vlgmr.msra.gmra.mxu3 %vm136_vm0, %v118_v11  ;;  %v123_v11 = vld [vmem:[%s613_s3 + $0x10] sm:$0xff] }
  0xb3   :  { %v130_v26 = vrot.slane %v129_v25, 4  ;;  %v75_v13 = vld [vmem:[%s611_s1 + $0x30] sm:$0xff]  ;;  %s437_s1 = smov [#allocation2]  }
  0xb4   :  { %91 = vxpose.xlu2.b32.cont [7/16] (narrow) %v75_v13, 8  ;;  %s354_s21 = sshll.u32 %s437_s1, 4  ;;  %s355_s21 = int_to_ptr.vmem [resolvable:$true] %s354_s21 }
  0xb5   :  { %v131_v27 = vadd.f32 %v130_v26, %v129_v25 }
  0xb7   :  { %v132_v28 = vrot.slane %v131_v27, 2 }
  0xb9   :  { %v133_v30 = vadd.f32 %v132_v28, %v131_v27 }
  0xba   :  { %367 = vmatmul.msk.f32.gmra.mxu3 %vm136_vm0, %v119_v8  ;;  %v126_v8 = vld [vmem:[%s614_s4] sm:$0xf] }
  0xbb   :  { %v134_v33 = vrot.slane %v133_v30, 1  ;;  %295 = vperm.xlu1 %389, %v126_v8  }
  0xbc   :  { %92 = vxpose.xlu2.b32.cont [8/16] (narrow) %v76_v14, 8 }
  0xbd   :  { %v135_v35 = vadd.f32 %v134_v33, %v133_v30 }
  0xbf   :  { %v196_v38 = vadd.f32 %v188_v36, %v135_v35  ;;  %v195_v41 = vadd.f32 %v184_v31, %v135_v35  ;;  %v194_v44 = vadd.f32 %v180_v40, %v135_v35  ;;  %v197_v46 = vadd.f32 %v192_v29, %v135_v35 }
  0xc2   :  { %368 = vmatmul.msk.f32.gmra.mxu3 %vm136_vm0, %v120_v5 }
  0xc4   :  { %93 = vxpose.xlu2.b32.cont [9/16] (narrow) %v77_v15, 8 }
  0xcc   :  { %94 = vxpose.xlu2.b32.cont [10/16] (narrow) %v78_v16, 8 }
  0xd4   :  { %95 = vxpose.xlu2.b32.cont [11/16] (narrow) %v79_v17, 8 }
  0xdc   :  { %96 = vxpose.xlu2.b32.cont [12/16] (narrow) %v80_v18, 8 }
  0xe1   :  { %390 = vset.pattern.permute.xlu0 %v436_v9 }
  0xe4   :  { %97 = vxpose.xlu2.b32.cont [13/16] (narrow) %v81_v19, 8 }
  0xec   :  { %98 = vxpose.xlu2.b32.cont [14/16] (narrow) %v82_v20, 8 }
  0xf4   :  { %99 = vxpose.xlu2.b32.cont [15/16] (narrow) %v83_v21, 8 }
  0xfc   :  { %100 = vxpose.xlu2.b32.end [16/16] (narrow) %v84_v22, 8 }
 0x12f   :  { %v166_v43 = vpop.f32.mrf.mxu0 }
 0x130   :  { %v198_v47 = vadd.f32 %v194_v44, %v166_v43 }
 0x132   :  { %v202_v53 = vmax.f32 %v198_v47, 0.0 }
 0x134   :  { %v206_v58 = vmul.f32 -0.5, %v202_v53 }
 0x135   :  { %v169_v32 = vpop.f32.mrf.mxu3 }
 0x136   :  { %v199_v45 = vadd.f32 %v195_v41, %v169_v32  ;;  %v210_v63 = vmul.f32 1.442695, %v206_v58 }
 0x138   :  { %v203_v50 = vmax.f32 %v199_v45, 0.0 }
 0x13a   :  { %v207_v56 = vmul.f32 -0.5, %v203_v50 }
 0x13c   :  { %v212_v61 = vmul.f32 1.442695, %v207_v56 }
 0x13d   :  { %v172_v37 = vpop.f32.mrf.mxu3 }
 0x13e   :  { %v200_v42 = vadd.f32 %v196_v38, %v172_v37 }
 0x140   :  { %v204_v48 = vmax.f32 %v200_v42, 0.0 }
 0x142   :  { %v208_v54 = vmul.f32 -0.5, %v204_v48 }
 0x144   :  { %v214_v59 = vmul.f32 1.442695, %v208_v54  ;;  %v101_v54 = vpop.trf.xlu2 }
 0x145   :  { %v175_v49 = vpop.f32.mrf.mxu3 }
 0x146   :  { %v201_v51 = vadd.f32 %v197_v46, %v175_v49  ;;  %v296_v49 = vpop.permute.xlu1 %295 }
 0x148   :  { %v205_v55 = vmax.f32 %v201_v51, 0.0 }
 0x14a   :  { %v209_v57 = vmul.f32 -0.5, %v205_v55 }
 0x14c   :  { %v216_v60 = vmul.f32 1.442695, %v209_v57 }
 0x14e   :  { %391 = vpow2.f32 %v216_v60 }
 0x14f   :  { %393 = vpow2.f32 %v214_v59 }
 0x150   :  { %395 = vpow2.f32 %v212_v61 }
 0x151   :  { %397 = vpow2.f32 %v210_v63 }
 0x154   :  { %v540_v0 = vpop.eup %391 }
 0x155   :  { %246 = vmatpush.msrb.mxu0 %v540_v0  ;;  %376 = vmatpush.msra.mxu1 %v540_v0  ;;  %v394_v1 = vpop.eup %393 }
 0x156   :  { %377 = vmatpush.msra.mxu2 %v540_v0  ;;  %v396_v3 = vpop.eup %395 }
 0x157   :  { %247 = vmatpush.msrb.mxu0 %v394_v1  ;;  %378 = vmatpush.msra.mxu1 %v394_v1  ;;  %v398_v5 = vpop.eup %397 }
 0x158   :  { %379 = vmatpush.msra.mxu2 %v394_v1 }
 0x159   :  { %248 = vmatpush.msrb.mxu0 %v396_v3  ;;  %380 = vmatpush.msra.mxu1 %v396_v3 }
 0x15a   :  { %381 = vmatpush.msra.mxu2 %v396_v3 }
 0x15b   :  { %249 = vmatpush.msrb.mxu0 %v398_v5  ;;  %382 = vmatpush.msra.mxu1 %v398_v5 }
 0x15c   :  { %383 = vmatpush.msra.mxu2 %v398_v5  ;;  %369 = vmatmul.msk.f32.vlgmr.msrb.gmra.mxu0 %vm218_vm1, %v121_v4 }
 0x15d   :  { %370 = vmatmul.msk.f32.vlgmr.msra.gmra.mxu1 %vm218_vm1, %v122_v6  ;;  %372 = vmatmul.msk.f32.vlgmr.msra.gmra.mxu2 %vm218_vm1, %v124_v7 }
 0x165   :  { %371 = vmatmul.msk.f32.gmra.mxu1 %vm218_vm1, %v123_v11  ;;  %373 = vmatmul.msk.f32.gmra.mxu2 %vm218_vm1, %v125_v12 }
 0x1d9   :  { %v251_v24 = vpop.f32.mrf.mxu0 }
 0x1da   :  { %v254_v23 = vpop.f32.mrf.mxu1  ;;  %v266_v25 = vmul.f32 %v398_v5, %v251_v24 }
 0x1db   :  { %v267_v26 = vmul.f32 %v396_v3, %v254_v23 }
 0x1dd   :  { %v270_v29 = vadd.f32 %v267_v26, %v266_v25 }
 0x1e0   :  { %v260_v27 = vpop.f32.mrf.mxu2 }
 0x1e1   :  { %v269_v31 = vmul.f32 %v540_v0, %v260_v27  ;;  %v325_v0 = vmul.f32 %v101_v54, %v101_v54 }
 0x1e2   :  { %v257_v28 = vpop.f32.mrf.mxu1 }
 0x1e3   :  { %v268_v30 = vmul.f32 %v394_v1, %v257_v28  ;;  %v327_v2 = vsel %vm326_vm4, %v325_v0, 0.0 }
 0x1e4   :  { %v328_v5 = vrot.slane %v327_v2, 4 }
 0x1e5   :  { %v271_v32 = vadd.f32 %v270_v29, %v268_v30 }
 0x1e6   :  { %v329_v7 = vadd.f32 %v328_v5, %v327_v2 }
 0x1e7   :  { %v272_v33 = vadd.f32 %v271_v32, %v269_v31 }
 0x1e8   :  { %v263_v55 = vpop.f32.mrf.mxu2  ;;  %v330_v12 = vrot.slane %v329_v7, 2 }
 0x1e9   :  { %v273_v34 = vrot.slane %v272_v33, 4 }
 0x1ea   :  { %v331_v17 = vadd.f32 %v330_v12, %v329_v7 }
 0x1eb   :  { %v274_v35 = vadd.f32 %v273_v34, %v272_v33 }
 0x1ec   :  { %v332_v21 = vrot.slane %v331_v17, 1 }
 0x1ed   :  { %v275_v36 = vrot.slane %v274_v35, 2 }
 0x1ee   :  { %v333_v25 = vadd.f32 %v332_v21, %v331_v17 }
 0x1ef   :  { %v276_v37 = vadd.f32 %v275_v36, %v274_v35 }
 0x1f0   :  { %v334_v29 = vmul.f32 -0.5, %v333_v25 }
 0x1f1   :  { %v277_v38 = vrot.slane %v276_v37, 1 }
 0x1f3   :  { %v278_v39 = vadd.f32 %v277_v38, %v276_v37 }
 0x1f5   :  { %v279_v40 = vsub.f32 1.0, %v278_v39 }
 0x1f7   :  { %v280_v41 = vmax.f32 %v279_v40, 1e-06 }
 0x1f9   :  { %399 = vrsqrt.f32 %v280_v41  ;;  %vm288_vm2 = vcmp.eq.f32.partialorder %v280_v41, inf  ;;  %v291_v50 = vand.u32 2147483648, %v280_v41  ;;  %vm290_vm3 = vcmp.eq.f32.partialorder %v280_v41, 0.0 }
 0x1ff   :  { %v400_v42 = vpop.eup %399 }
 0x200   :  { %v282_v43 = vmul.f32 %v400_v42, %v280_v41 }
 0x202   :  { %v283_v44 = vmul.f32 %v400_v42, %v282_v43 }
 0x204   :  { %v284_v45 = vmul.f32 0.5, %v283_v44 }
 0x206   :  { %v285_v46 = vsub.f32 1.5, %v284_v45 }
 0x208   :  { %v286_v47 = vmul.f32 %v400_v42, %v285_v46 }
 0x20a   :  { %v287_v48 = vmul.f32 %v286_v47, %v280_v41 }
 0x20c   :  { %v289_v51 = vsel %vm288_vm2, %v280_v41, %v287_v48 }
 0x20d   :  { %v292_v52 = vsel %vm290_vm3, %v291_v50, %v289_v51 }
 0x20e   :  { %v298_v53 = vmul.f32 %v296_v49, %v292_v52 }
 0x210   :  { %v299_v56 = vmul.f32 %v298_v53, %v101_v54 }
 0x212   :  { %v300_v57 = vadd.f32 %v299_v56, %v263_v55 }
 0x214   :  { %401 = vtanh.f32 %v300_v57  ;;  %v303_v58 = vmul.f32 -2.0, %v300_v57  ;;  %v302_v16 = vsub.f32 0.6931472, %v300_v57 }
 0x216   :  { %v305_v59 = vsub.f32 0.0, %v303_v58  ;;  %v304_v13 = vmax.f32 %v303_v58, 0.0 }
 0x218   :  { %v308_v60 = vand.u32 2147483647, %v305_v59  ;;  %vm306_vm6 = vcmp.ne.f32.partialorder %v305_v59, %v305_v59 }
 0x21a   :  { %v402_v61 = vpop.eup %401  ;;  %v309_v62 = vsub.f32 0.0, %v308_v60 }
 0x21b   :  { %347 = vst [vmem:[#allocation2] sm:$0xf] %v402_v61 }
 0x21c   :  { %v310_v63 = vmul.f32 1.442695, %v309_v62 }
 0x21e   :  { %403 = vpow2.f32 %v310_v63 }
 0x224   :  { %v404_v1 = vpop.eup %403 }
 0x225   :  { %v312_v3 = vadd.f32 1.0, %v404_v1  ;;  %v315_v4 = vmul.f32 -0.5, %v404_v1  ;;  %v318_v8 = vand.u32 2147483647, %v404_v1 }
 0x227   :  { %405 = vlog2.f32 %v312_v3  ;;  %v316_v6 = vadd.f32 1.0, %v315_v4  ;;  %vm319_vm5 = vcmp.lt.f32.partialorder %v318_v8, 0.0004427343 }
 0x228   :  { %407 = vlog2.f32 %v280_v41 }
 0x229   :  { %v317_v11 = vmul.f32 %v404_v1, %v316_v6 }
 0x22d   :  { %v406_v9 = vpop.eup %405 }
 0x22e   :  { %v314_v10 = vmul.f32 0.6931472, %v406_v9  ;;  %v408_v22 = vpop.eup %407 }
 0x22f   :  { %v336_v27 = vmul.f32 0.6931472, %v408_v22 }
 0x230   :  { %v320_v14 = vsel %vm319_vm5, %v317_v11, %v314_v10 }
 0x231   :  { %v321_v15 = vadd.f32 %v320_v14, %v304_v13  ;;  %v337_v30 = vmul.f32 2.0, %v336_v27 }
 0x233   :  { %v322_v18 = vsel %vm306_vm6, %v303_v58, %v321_v15  ;;  %v338_v33 = vsub.f32 %v334_v29, %v337_v30 }
 0x234   :  { %v323_v19 = vsub.f32 %v302_v16, %v322_v18 }
 0x236   :  { %v324_v20 = vmul.f32 2.0, %v323_v19 }
 0x238   :  { %v339_v23 = vsel %vm326_vm4, %v324_v20, 0.0 }
 0x239   :  { %v340_v24 = vrot.slane %v339_v23, 4 }
 0x23b   :  { %v341_v26 = vadd.f32 %v340_v24, %v339_v23 }
 0x23d   :  { %v342_v28 = vrot.slane %v341_v26, 2 }
 0x23f   :  { %v343_v31 = vadd.f32 %v342_v28, %v341_v26 }
 0x241   :  { %v344_v32 = vrot.slane %v343_v31, 1 }
 0x243   :  { %v345_v34 = vadd.f32 %v344_v32, %v343_v31 }
 0x245   :  { %v346_v35 = vsub.f32 %v338_v33, %v345_v34 }
 0x247   :  { %348 = vst [vmem:[#allocation2 + $0x4] sm:$0x1] %v346_v35 }
 0x248   :  { %359 = dma.vmem_to_hbm [thread:$0]  %s355_s21, 128, %s357_s24, [#allocation3]  }
 0x249   :  { %433 = dma.done.wait [#allocation3], 128  }
 0x24a   :  { %434 = vsyncadd [#allocation3], 4294967168 }
 0x24b   :  { %364 = vsyncpa [#allocation3], 1 }

</bundles_post_ra>
